<compile_context>
chip_gen: v7x
topology: tpu7x:2x2x1
jax: 0.10.0
libtpu: 0.0.40
codegen_flags: <defaults>
</compile_context>

<pallas_src>
import functools
import math

import jax
import jax.numpy as jnp
import numpy as np
from jax import lax
from jax.experimental import pallas as pl
from jax.experimental.pallas import tpu as pltpu

_MASK_VALUE = -1e30   # finite sentinel (avoids NaN on fully-masked rows)
_LANES = 128          # lane width; m/l scratch is lane-replicated


def _rep_lanes(x, n):
    """x has identical values in every lane of its last axis; widen it to n lanes."""
    L = x.shape[-1]
    if n == L:
        return x
    if n % L == 0:
        return jnp.concatenate([x] * (n // L), axis=-1)
    return jnp.broadcast_to(x[..., :1], x.shape[:-1] + (n,))


def _flash_attn_kernel(*refs, scale, has_mask, causal, seq_len, padded, qk_dtype):
    if has_mask:
        q_ref, k_ref, v_ref, mask_ref, o_ref, q_sc, m_sc, l_sc, acc_sc = refs
    else:
        q_ref, k_ref, v_ref, o_ref, q_sc, m_sc, l_sc, acc_sc = refs
        mask_ref = None

    qi = pl.program_id(1)
    ki = pl.program_id(2)
    G, tq, d = q_ref.shape
    tk = k_ref.shape[1]

    @pl.when(ki == 0)
    def _init():
        # Fold 1/sqrt(d) into q once per q-tile; reused for every kv step.
        q_sc[...] = (q_ref[...] * scale).astype(q_sc.dtype)
        m_sc[...] = jnp.full(m_sc.shape, _MASK_VALUE, jnp.float32)
        l_sc[...] = jnp.zeros(l_sc.shape, jnp.float32)
        acc_sc[...] = jnp.zeros(acc_sc.shape, jnp.float32)

    def _compute():
        q = q_sc[...]                       # (G, tq, d), scaled, resident
        k = k_ref[...]                      # (G, tk, d)
        v = v_ref[...]                      # (G, tk, d)
        if qk_dtype is not None:
            k = k.astype(qk_dtype)
            v = v.astype(qk_dtype)

        # q @ k^T, contraction on the last axis of both operands (no explicit
        # transpose), f32 MXU accumulation.
        s = jnp.einsum("gqd,gkd->gqk", q, k,
                       preferred_element_type=jnp.float32)   # (G,tq,tk) f32

        if mask_ref is not None:
            s = jnp.where(mask_ref[...] != 0, s, _MASK_VALUE)
        if causal:
            q_pos = qi * tq + lax.broadcasted_iota(jnp.int32, (1, tq, tk), 1)
            k_pos = ki * tk + lax.broadcasted_iota(jnp.int32, (1, tq, tk), 2)
            s = jnp.where(q_pos >= k_pos, s, _MASK_VALUE)
        if padded:
            k_pos = ki * tk + lax.broadcasted_iota(jnp.int32, (1, tq, tk), 2)
            s = jnp.where(k_pos < seq_len, s, _MASK_VALUE)

        # Online softmax update (f32).  m/l scratch is lane-replicated.
        m_prev = m_sc[...]                                  # (G,tq,128)
        m_cur = jnp.max(s, axis=-1, keepdims=True)          # (G,tq,1)
        m_new = jnp.maximum(m_prev, m_cur)                  # (G,tq,128)
        alpha = jnp.exp(m_prev - m_new)                     # (G,tq,128)
        p = jnp.exp(s - _rep_lanes(m_new, tk))              # (G,tq,tk)

        l_sc[...] = alpha * l_sc[...] + jnp.sum(p, axis=-1, keepdims=True)
        acc_sc[...] = _rep_lanes(alpha, d) * acc_sc[...] + jnp.einsum(
            "gqk,gkd->gqd", p.astype(v.dtype), v,
            preferred_element_type=jnp.float32)
        m_sc[...] = m_new

    if causal:
        # Blocks strictly above the diagonal contribute exactly nothing:
        # skip QK^T / softmax / PV (their K/V tiles are also not re-fetched,
        # because the kv index_map clamps past the diagonal).
        pl.when((qi * tq + tq - 1) >= (ki * tk))(_compute)
    else:
        _compute()

    @pl.when(ki == pl.num_programs(2) - 1)
    def _finalize():
        l = l_sc[...]
        inv_l = pl.reciprocal(l, approx=True)       # EUP slot, ~free
        inv_l = inv_l * (2.0 - l * inv_l)           # one Newton step -> ~exact
        o_ref[...] = (acc_sc[...] * _rep_lanes(inv_l, d)).astype(o_ref.dtype)


def _pick_tile(s, target):
    """Largest lane-aligned tile <= target dividing s; small s -> full s."""
    if s <= target:
        return s
    t = (min(target, s) // _LANES) * _LANES
    while t >= _LANES:
        if s % t == 0:
            return t
        t -= _LANES
    return s


def _divisor_at_most(n, cap):
    cap = max(1, min(n, cap))
    for g in range(cap, 0, -1):
        if n % g == 0:
            return g
    return 1


def _vmem_capacity_bytes():
    try:
        return int(pltpu.get_tpu_info().vmem_capacity_bytes)
    except Exception:
        return 64 * 1024 * 1024   # conservative (v7x-sized) fallback


def dot_product_attention(query, keys, vals, mask=None, *, is_causal=False,
                          qk_dtype=None):
    """Flash-style scaled dot-product attention (forward pass, eval dropout).

    query, keys, vals: (B, H, S, d).  mask: optional, broadcastable to
    (B, H, S, S); positions where mask == 0 are masked out.  A concrete
    batch/head-shared causal mask is auto-detected and generated in-kernel
    (no mask DMA); `is_causal=True` forces that path.  `qk_dtype` optionally
    casts the matmul operands (e.g. jnp.bfloat16) for full-rate MXU.

    Returns the attention output (B, H, S, d) in the input dtype.
    """
    B, H, S, d = query.shape
    BH = B * H
    scale = 1.0 / math.sqrt(d)
    out_dtype = query.dtype
    in_itemsize = jnp.dtype(query.dtype).itemsize

    # ---- generation-aware VMEM budgeting (v5e/v6e: 128 MiB, v7x: 64 MiB) ----
    vmem_cap = _vmem_capacity_bytes()
    vmem_limit = min(vmem_cap * 3 // 4, 96 * 1024 * 1024)
    tq_target = 512 if vmem_cap >= 100 * 1024 * 1024 else 256
    tk_target = 256
    group_budget = min(vmem_limit // 3, 32 * 1024 * 1024)

    # ---- causal-mask detection (avoids the S^2 mask DMA entirely) ----
    causal = bool(is_causal)
    if not causal and mask is not None:
        try:
            m_np = np.asarray(mask)
        except Exception:           # traced mask: fall back to the DMA path
            m_np = None
        if m_np is not None:
            while m_np.ndim < 4:
                m_np = m_np[None]
            if (m_np.shape[0] == 1 and m_np.shape[1] == 1
                    and m_np.shape[-2:] == (S, S)):
                causal = bool(np.array_equal(
                    m_np[0, 0] != 0, np.tril(np.ones((S, S), dtype=bool))))
    use_mask = (mask is not None) and not causal

    # ---- pad S to a multiple of 128 when no lane-aligned tile divides it ----
    S_pad = S
    if S > tk_target and S % _LANES != 0:
        S_pad = ((S + _LANES - 1) // _LANES) * _LANES
    padded = S_pad != S

    tq = _pick_tile(S_pad, tq_target)
    tk = _pick_tile(S_pad, tk_target)

    q = query.reshape(BH, S, d)
    k = keys.reshape(BH, S, d)
    v = vals.reshape(BH, S, d)
    if padded:
        pad = ((0, 0), (0, S_pad - S), (0, 0))
        q, k, v = jnp.pad(q, pad), jnp.pad(k, pad), jnp.pad(v, pad)

    # mask operand (only when it cannot be generated in-kernel)
    mask_arr = None
    shared_mask = False
    if use_mask:
        m = jnp.asarray(mask)
        while m.ndim < 4:
            m = m[None]
        shared_mask = (m.shape[0] == 1 and m.shape[1] == 1)
        if shared_mask:
            mask_arr = (jnp.broadcast_to(m[0, 0], (S, S)) != 0).astype(jnp.int8)[None]
        else:
            mask_arr = (jnp.broadcast_to(m, (B, H, S, S)).reshape(BH, S, S)
                        != 0).astype(jnp.int8)
        if padded:
            mask_arr = jnp.pad(mask_arr,
                               ((0, 0), (0, S_pad - S), (0, S_pad - S)))

    # ---- (batch*head) grouping: amortize per-step overhead within budget ----
    per_g = (2 * (tq * d + 2 * tk * d) * in_itemsize          # dbl-buf q/k/v
             + 2 * tq * d * jnp.dtype(out_dtype).itemsize     # dbl-buf o
             + (2 * tq * tk if (use_mask and not shared_mask) else 0)
             + tq * d * in_itemsize                           # scaled-q scratch
             + 2 * tq * _LANES * 4 + tq * d * 4               # m, l, acc scratch
             + 3 * tq * tk * 4 + 2 * tq * d * 4)              # temporaries
    G = _divisor_at_most(BH, max(1, group_budget // max(per_g, 1)))
    # v7x has 2 TensorCores: keep the 'parallel' grid extent >= 2 when possible.
    if G > 1 and (BH // G) * (S_pad // tq) < 2:
        G = _divisor_at_most(BH, G - 1)

    grid = (BH // G, S_pad // tq, S_pad // tk)

    q_spec = pl.BlockSpec((G, tq, d), lambda g, qi, ki: (g, qi, 0))
    if causal:
        # Clamp the kv block index past the diagonal: the skipped blocks reuse
        # the already-resident K/V tile -> ~2x less K/V HBM streaming.
        kv_index = lambda g, qi, ki: (g, jnp.minimum(ki, (qi * tq + tq - 1) // tk), 0)
    else:
        kv_index = lambda g, qi, ki: (g, ki, 0)
    kv_spec = pl.BlockSpec((G, tk, d), kv_index)

    in_specs = [q_spec, kv_spec, kv_spec]
    operands = [q, k, v]
    if use_mask:
        if shared_mask:
            in_specs.append(pl.BlockSpec((1, tq, tk), lambda g, qi, ki: (0, qi, ki)))
        else:
            in_specs.append(pl.BlockSpec((G, tq, tk), lambda g, qi, ki: (g, qi, ki)))
        operands.append(mask_arr)

    out_spec = pl.BlockSpec((G, tq, d), lambda g, qi, ki: (g, qi, 0))
    out_shape = jax.ShapeDtypeStruct((BH, S_pad, d), out_dtype)

    kernel = functools.partial(
        _flash_attn_kernel, scale=scale, has_mask=use_mask, causal=causal,
        seq_len=S, padded=padded, qk_dtype=qk_dtype)

    out = pl.pallas_call(
        kernel,
        out_shape=out_shape,
        grid_spec=pltpu.PrefetchScalarGridSpec(
            num_scalar_prefetch=0,
            grid=grid,
            in_specs=in_specs,
            out_specs=out_spec,
            scratch_shapes=[
                pltpu.VMEM((G, tq, d), qk_dtype or query.dtype),  # scaled q
                pltpu.VMEM((G, tq, _LANES), jnp.float32),          # running max
                pltpu.VMEM((G, tq, _LANES), jnp.float32),          # running denom
                pltpu.VMEM((G, tq, d), jnp.float32),               # out accumulator
            ],
        ),
        compiler_params=pltpu.CompilerParams(
            dimension_semantics=("parallel", "parallel", "arbitrary"),
            vmem_limit_bytes=int(vmem_limit),
        ),
    )(*operands)

    if padded:
        out = out[:, :S, :]
    return out.reshape(B, H, S, d)


def _reference(query, keys, vals, mask=None):
    dh = query.shape[-1]
    s = jnp.einsum("bhqd,bhkd->bhqk", query, keys) / math.sqrt(dh)
    if mask is not None:
        s = jnp.where(mask == 0, -jnp.inf, s)
    w = jax.nn.softmax(s, axis=-1)
    return jnp.einsum("bhqk,bhkd->bhqd", w, vals)


if __name__ == "__main__":
    key = jax.random.PRNGKey(0)
    k0, k1, k2, k3, k4, k5 = jax.random.split(key, 6)

    # Both the kernel and the reference run their f32 matmuls through the TPU
    # MXU (bf16-pass default precision), so small (~1e-2-level) uncorrelated
    # rounding differences are expected; tolerances are set accordingly.
    TOL = dict(atol=2e-2, rtol=2e-2)

    # ---- small shapes matching typical module usage ----
    B, H, S, d = 2, 4, 8, 32
    q = jax.random.normal(k0, (B, H, S, d), dtype=jnp.float32)
    kk = jax.random.normal(k1, (B, H, S, d), dtype=jnp.float32)
    v = jax.random.normal(k2, (B, H, S, d), dtype=jnp.float32)

    # 1) unmasked path
    out = jax.block_until_ready(dot_product_attention(q, kk, v))
    assert jnp.allclose(out, _reference(q, kk, v), **TOL)

    # 2) causal mask (auto-detected -> generated in-kernel, no mask DMA)
    causal = jnp.tril(jnp.ones((S, S), dtype=jnp.int32))[None, None]
    out_c = jax.block_until_ready(dot_product_attention(q, kk, v, mask=causal))
    assert jnp.allclose(out_c, _reference(q, kk, v, mask=causal), **TOL)

    # 3) arbitrary (non-causal) mask -> shared int8 DMA path
    rnd = (jax.random.uniform(k3, (1, 1, S, S)) > 0.3).astype(jnp.int32)
    rnd = jnp.maximum(rnd, jnp.eye(S, dtype=jnp.int32)[None, None])  # no empty rows
    out_m = jax.block_until_ready(dot_product_attention(q, kk, v, mask=rnd))
    assert jnp.allclose(out_m, _reference(q, kk, v, mask=rnd), **TOL)

    # 4) longer causal sequence: exercises kv tiling, above-diagonal block
    #    skipping and the clamped kv index_map.
    B2, H2, S2, d2 = 1, 2, 1024, 64
    q2 = jax.random.normal(k4, (B2, H2, S2, d2), dtype=jnp.float32)
    kk2 = jax.random.normal(k5, (B2, H2, S2, d2), dtype=jnp.float32)
    v2 = jax.random.normal(k0, (B2, H2, S2, d2), dtype=jnp.float32)
    out2 = jax.block_until_ready(dot_product_attention(q2, kk2, v2, is_causal=True))
    causal2 = jnp.tril(jnp.ones((S2, S2), dtype=jnp.int32))[None, None]
    assert jnp.allclose(out2, _reference(q2, kk2, v2, mask=causal2), **TOL)

    # 5) awkward sequence length -> padded to a multiple of 128 in the wrapper
    S3 = 576
    q3 = jax.random.normal(k1, (1, 2, S3, 64), dtype=jnp.float32)
    kk3 = jax.random.normal(k2, (1, 2, S3, 64), dtype=jnp.float32)
    v3 = jax.random.normal(k3, (1, 2, S3, 64), dtype=jnp.float32)
    out3 = jax.block_until_ready(dot_product_attention(q3, kk3, v3))
    assert jnp.allclose(out3, _reference(q3, kk3, v3), **TOL)

    print("KERNEL_OK")
</pallas_src>

<mosaic_0001>
module attributes {stable_mosaic.version = 11 : i64} {
  func.func @_flash_attn_kernel(%arg0: i32, %arg1: i32, %arg2: i32, %arg3: memref<4x8x32xf32, #tpu.memory_space<vmem>>, %arg4: memref<4x8x32xf32, #tpu.memory_space<vmem>>, %arg5: memref<4x8x32xf32, #tpu.memory_space<vmem>>, %arg6: memref<4x8x32xf32, #tpu.memory_space<vmem>>, %arg7: memref<4x8x32xf32, #tpu.memory_space<vmem>>, %arg8: memref<4x8x128xf32, #tpu.memory_space<vmem>>, %arg9: memref<4x8x128xf32, #tpu.memory_space<vmem>>, %arg10: memref<4x8x32xf32, #tpu.memory_space<vmem>>) attributes {dimension_semantics = [#tpu.dimension_semantics<parallel>, #tpu.dimension_semantics<parallel>, #tpu.dimension_semantics<arbitrary>], iteration_bounds = array<i64: 2, 1, 1>, scalar_prefetch = 0 : i64, scratch_operands = 4 : i64, tpu.core_type = #tpu.core_type<tc>, window_params = [{transform_indices = @transform_0, window_bounds = array<i64: 4, 8, 32>}, {transform_indices = @transform_1, window_bounds = array<i64: 4, 8, 32>}, {transform_indices = @transform_2, window_bounds = array<i64: 4, 8, 32>}, {transform_indices = @transform_3, window_bounds = array<i64: 4, 8, 32>}]} {
    %c0_i32 = arith.constant 0 : i32
    %0 = arith.cmpi eq, %arg2, %c0_i32 : i32
    %1 = arith.extui %0 : i1 to i32
    %c0_i32_0 = arith.constant 0 : i32
    %2 = arith.cmpi ne, %1, %c0_i32_0 : i32
    scf.if %2 {
      %c0_32 = arith.constant 0 : index
      %c0_33 = arith.constant 0 : index
      %c0_34 = arith.constant 0 : index
      %38 = vector.load %arg3[%c0_32, %c0_33, %c0_34] : memref<4x8x32xf32, #tpu.memory_space<vmem>>, vector<4x8x32xf32>
      %cst_35 = arith.constant 0.176776692 : f32
      %39 = vector.broadcast %cst_35 : f32 to vector<4x8x32xf32>
      %40 = arith.mulf %38, %39 : vector<4x8x32xf32>
      %c0_36 = arith.constant 0 : index
      %c0_37 = arith.constant 0 : index
      %c0_38 = arith.constant 0 : index
      %41 = vector.load %arg7[%c0_36, %c0_37, %c0_38] : memref<4x8x32xf32, #tpu.memory_space<vmem>>, vector<4x8x32xf32>
      tpu.vector_store %arg7[%c0_36, %c0_37, %c0_38], %40 {strides = array<i32>} : memref<4x8x32xf32, #tpu.memory_space<vmem>>, vector<4x8x32xf32>,
      %cst_39 = arith.constant -1.000000e+30 : f32
      %42 = vector.broadcast %cst_39 : f32 to vector<4x8x128xf32>
      %c0_40 = arith.constant 0 : index
      %c0_41 = arith.constant 0 : index
      %c0_42 = arith.constant 0 : index
      %43 = vector.load %arg8[%c0_40, %c0_41, %c0_42] : memref<4x8x128xf32, #tpu.memory_space<vmem>>, vector<4x8x128xf32>
      tpu.vector_store %arg8[%c0_40, %c0_41, %c0_42], %42 {strides = array<i32>} : memref<4x8x128xf32, #tpu.memory_space<vmem>>, vector<4x8x128xf32>,
      %cst_43 = arith.constant 0.000000e+00 : f32
      %44 = vector.broadcast %cst_43 : f32 to vector<4x8x128xf32>
      %c0_44 = arith.constant 0 : index
      %c0_45 = arith.constant 0 : index
      %c0_46 = arith.constant 0 : index
      %45 = vector.load %arg9[%c0_44, %c0_45, %c0_46] : memref<4x8x128xf32, #tpu.memory_space<vmem>>, vector<4x8x128xf32>
      tpu.vector_store %arg9[%c0_44, %c0_45, %c0_46], %44 {strides = array<i32>} : memref<4x8x128xf32, #tpu.memory_space<vmem>>, vector<4x8x128xf32>,
      %cst_47 = arith.constant 0.000000e+00 : f32
      %46 = vector.broadcast %cst_47 : f32 to vector<4x8x32xf32>
      %c0_48 = arith.constant 0 : index
      %c0_49 = arith.constant 0 : index
      %c0_50 = arith.constant 0 : index
      %47 = vector.load %arg10[%c0_48, %c0_49, %c0_50] : memref<4x8x32xf32, #tpu.memory_space<vmem>>, vector<4x8x32xf32>
      tpu.vector_store %arg10[%c0_48, %c0_49, %c0_50], %46 {strides = array<i32>} : memref<4x8x32xf32, #tpu.memory_space<vmem>>, vector<4x8x32xf32>,
    } else {
    }
    %c0 = arith.constant 0 : index
    %c0_1 = arith.constant 0 : index
    %c0_2 = arith.constant 0 : index
    %3 = vector.load %arg7[%c0, %c0_1, %c0_2] : memref<4x8x32xf32, #tpu.memory_space<vmem>>, vector<4x8x32xf32>
    %c0_3 = arith.constant 0 : index
    %c0_4 = arith.constant 0 : index
    %c0_5 = arith.constant 0 : index
    %4 = vector.load %arg4[%c0_3, %c0_4, %c0_5] : memref<4x8x32xf32, #tpu.memory_space<vmem>>, vector<4x8x32xf32>
    %c0_6 = arith.constant 0 : index
    %c0_7 = arith.constant 0 : index
    %c0_8 = arith.constant 0 : index
    %5 = vector.load %arg5[%c0_6, %c0_7, %c0_8] : memref<4x8x32xf32, #tpu.memory_space<vmem>>, vector<4x8x32xf32>
    "tpu.trace_start"() <{level = 10 : i32, message = "gqd,gkd->gqk"}> : () -> ()
    %cst = arith.constant dense<0.000000e+00> : vector<4x8x8xf32>
    %6 = tpu.matmul %3, %4, %cst {dimension_numbers = #tpu.dot_dimension_numbers<[2], [2], [1], [1], [0, 0, 0, 1, 1, 1], [0], [0]>} : vector<4x8x32xf32>, vector<4x8x32xf32>, vector<4x8x8xf32> -> vector<4x8x8xf32>
    "tpu.trace_stop"() : () -> ()
    %c0_9 = arith.constant 0 : index
    %c0_10 = arith.constant 0 : index
    %c0_11 = arith.constant 0 : index
    %7 = vector.load %arg8[%c0_9, %c0_10, %c0_11] : memref<4x8x128xf32, #tpu.memory_space<vmem>>, vector<4x8x128xf32>
    %cst_12 = arith.constant dense<0xFF800000> : vector<4x8xf32>
    %8 = vector.multi_reduction <maximumf>, %6, %cst_12 [2] : vector<4x8x8xf32> to vector<4x8xf32>
    %9 = vector.shape_cast %8 : vector<4x8xf32> to vector<4x8x1xf32>
    %10 = vector.broadcast %9 : vector<4x8x1xf32> to vector<4x8x128xf32>
    %11 = arith.maximumf %7, %10 : vector<4x8x128xf32>
    %12 = arith.subf %7, %11 : vector<4x8x128xf32>
    %13 = math.exp %12 : vector<4x8x128xf32>
    %14 = vector.extract_strided_slice %11 {offsets = [0, 0, 0], sizes = [4, 8, 1], strides = [1, 1, 1]} : vector<4x8x128xf32> to vector<4x8x1xf32>
    %15 = vector.shape_cast %14 : vector<4x8x1xf32> to vector<4x8x1xf32>
    %16 = vector.broadcast %15 : vector<4x8x1xf32> to vector<4x8x8xf32>
    %17 = arith.subf %6, %16 : vector<4x8x8xf32>
    %18 = math.exp %17 : vector<4x8x8xf32>
    %c0_13 = arith.constant 0 : index
    %c0_14 = arith.constant 0 : index
    %c0_15 = arith.constant 0 : index
    %19 = vector.load %arg9[%c0_13, %c0_14, %c0_15] : memref<4x8x128xf32, #tpu.memory_space<vmem>>, vector<4x8x128xf32>
    %20 = arith.mulf %13, %19 : vector<4x8x128xf32>
    %cst_16 = arith.constant dense<0.000000e+00> : vector<4x8xf32>
    %21 = vector.multi_reduction <add>, %18, %cst_16 [2] : vector<4x8x8xf32> to vector<4x8xf32>
    %22 = vector.shape_cast %21 : vector<4x8xf32> to vector<4x8x1xf32>
    %23 = vector.broadcast %22 : vector<4x8x1xf32> to vector<4x8x128xf32>
    %24 = arith.addf %20, %23 : vector<4x8x128xf32>
    %c0_17 = arith.constant 0 : index
    %c0_18 = arith.constant 0 : index
    %c0_19 = arith.constant 0 : index
    %25 = vector.load %arg9[%c0_17, %c0_18, %c0_19] : memref<4x8x128xf32, #tpu.memory_space<vmem>>, vector<4x8x128xf32>
    tpu.vector_store %arg9[%c0_17, %c0_18, %c0_19], %24 {strides = array<i32>} : memref<4x8x128xf32, #tpu.memory_space<vmem>>, vector<4x8x128xf32>,
    %26 = vector.extract_strided_slice %13 {offsets = [0, 0, 0], sizes = [4, 8, 1], strides = [1, 1, 1]} : vector<4x8x128xf32> to vector<4x8x1xf32>
    %27 = vector.shape_cast %26 : vector<4x8x1xf32> to vector<4x8x1xf32>
    %28 = vector.broadcast %27 : vector<4x8x1xf32> to vector<4x8x32xf32>
    %c0_20 = arith.constant 0 : index
    %c0_21 = arith.constant 0 : index
    %c0_22 = arith.constant 0 : index
    %29 = vector.load %arg10[%c0_20, %c0_21, %c0_22] : memref<4x8x32xf32, #tpu.memory_space<vmem>>, vector<4x8x32xf32>
    %30 = arith.mulf %28, %29 : vector<4x8x32xf32>
    "tpu.trace_start"() <{level = 10 : i32, message = "gqk,gkd->gqd"}> : () -> ()
    %cst_23 = arith.constant dense<0.000000e+00> : vector<4x8x32xf32>
    %31 = tpu.matmul %18, %5, %cst_23 {dimension_numbers = #tpu.dot_dimension_numbers<[2], [1], [1], [2], [0, 0, 0, 1, 1, 2], [0], [0]>} : vector<4x8x8xf32>, vector<4x8x32xf32>, vector<4x8x32xf32> -> vector<4x8x32xf32>
    "tpu.trace_stop"() : () -> ()
    %32 = arith.addf %30, %31 : vector<4x8x32xf32>
    %c0_24 = arith.constant 0 : index
    %c0_25 = arith.constant 0 : index
    %c0_26 = arith.constant 0 : index
    %33 = vector.load %arg10[%c0_24, %c0_25, %c0_26] : memref<4x8x32xf32, #tpu.memory_space<vmem>>, vector<4x8x32xf32>
    tpu.vector_store %arg10[%c0_24, %c0_25, %c0_26], %32 {strides = array<i32>} : memref<4x8x32xf32, #tpu.memory_space<vmem>>, vector<4x8x32xf32>,
    %c0_27 = arith.constant 0 : index
    %c0_28 = arith.constant 0 : index
    %c0_29 = arith.constant 0 : index
    %34 = vector.load %arg8[%c0_27, %c0_28, %c0_29] : memref<4x8x128xf32, #tpu.memory_space<vmem>>, vector<4x8x128xf32>
    tpu.vector_store %arg8[%c0_27, %c0_28, %c0_29], %11 {strides = array<i32>} : memref<4x8x128xf32, #tpu.memory_space<vmem>>, vector<4x8x128xf32>,
    %c0_i32_30 = arith.constant 0 : i32
    %35 = arith.cmpi eq, %arg2, %c0_i32_30 : i32
    %36 = arith.extui %35 : i1 to i32
    %c0_i32_31 = arith.constant 0 : i32
    %37 = arith.cmpi ne, %36, %c0_i32_31 : i32
    scf.if %37 {
      %c0_32 = arith.constant 0 : index
      %c0_33 = arith.constant 0 : index
      %c0_34 = arith.constant 0 : index
      %38 = vector.load %arg9[%c0_32, %c0_33, %c0_34] : memref<4x8x128xf32, #tpu.memory_space<vmem>>, vector<4x8x128xf32>
      %39 = tpu.reciprocal %38 {approx = true} : vector<4x8x128xf32> -> vector<4x8x128xf32>
      %40 = arith.mulf %38, %39 : vector<4x8x128xf32>
      %cst_35 = arith.constant 2.000000e+00 : f32
      %41 = vector.broadcast %cst_35 : f32 to vector<4x8x128xf32>
      %42 = arith.subf %41, %40 : vector<4x8x128xf32>
      %43 = arith.mulf %39, %42 : vector<4x8x128xf32>
      %c0_36 = arith.constant 0 : index
      %c0_37 = arith.constant 0 : index
      %c0_38 = arith.constant 0 : index
      %44 = vector.load %arg10[%c0_36, %c0_37, %c0_38] : memref<4x8x32xf32, #tpu.memory_space<vmem>>, vector<4x8x32xf32>
      %45 = vector.extract_strided_slice %43 {offsets = [0, 0, 0], sizes = [4, 8, 1], strides = [1, 1, 1]} : vector<4x8x128xf32> to vector<4x8x1xf32>
      %46 = vector.shape_cast %45 : vector<4x8x1xf32> to vector<4x8x1xf32>
      %47 = vector.broadcast %46 : vector<4x8x1xf32> to vector<4x8x32xf32>
      %48 = arith.mulf %44, %47 : vector<4x8x32xf32>
      %c0_39 = arith.constant 0 : index
      %c0_40 = arith.constant 0 : index
      %c0_41 = arith.constant 0 : index
      %49 = vector.load %arg6[%c0_39, %c0_40, %c0_41] : memref<4x8x32xf32, #tpu.memory_space<vmem>>, vector<4x8x32xf32>
      tpu.vector_store %arg6[%c0_39, %c0_40, %c0_41], %48 {strides = array<i32>} : memref<4x8x32xf32, #tpu.memory_space<vmem>>, vector<4x8x32xf32>,
    } else {
    }
    return
  }
  func.func @transform_0(%arg0: i32, %arg1: i32, %arg2: i32) -> (i32, i32, i32) {
    %c0_i32 = arith.constant 0 : i32
    %c0_i32_0 = arith.constant 0 : i32
    return %arg0, %arg1, %c0_i32 : i32, i32, i32
  }
  func.func @transform_1(%arg0: i32, %arg1: i32, %arg2: i32) -> (i32, i32, i32) {
    %c0_i32 = arith.constant 0 : i32
    %c0_i32_0 = arith.constant 0 : i32
    return %arg0, %arg2, %c0_i32 : i32, i32, i32
  }
  func.func @transform_2(%arg0: i32, %arg1: i32, %arg2: i32) -> (i32, i32, i32) {
    %c0_i32 = arith.constant 0 : i32
    %c0_i32_0 = arith.constant 0 : i32
    return %arg0, %arg2, %c0_i32 : i32, i32, i32
  }
  func.func @transform_3(%arg0: i32, %arg1: i32, %arg2: i32) -> (i32, i32, i32) {
    %c0_i32 = arith.constant 0 : i32
    %c0_i32_0 = arith.constant 0 : i32
    return %arg0, %arg1, %c0_i32 : i32, i32, i32
  }
}

</mosaic_0001>

<bundles_post_ra>
// kernel: tpu_custom_call.1
= control target key start
LH: loop header
LB: loop body
LE: loop exit
PB: predicated region body
PF: predicated region fallthrough
CT: control target
= control target key end

     0   :  { %s2045_s0 = inlined_call_operand.hbm [shape: f32[8,8,32], index: 0, kind: input, shape index: {}]   ;;  %s2046_s1 = inlined_call_operand.hbm [shape: f32[8,8,32], index: 1, kind: input, shape index: {}]   ;;  %s2047_s2 = inlined_call_operand.hbm [shape: f32[8,8,32], index: 2, kind: input, shape index: {}]   ;;  %s2048_s3 = inlined_call_operand.hbm [shape: f32[8,8,32], index: 3, kind: output, shape index: {}]  }
   0x1   :  { %2058 = sst [smem:[#allocation19_spill]] %s2046_s1 }
   0x2   :  { %8 = vsyncpa [#allocation7], 0 }
   0x3   :  { %10 = vsyncpa [#allocation7 + $0x1], 0 }
   0x4   :  { %11 = vsyncpa [#allocation10], 0 }
   0x5   :  { %13 = vsyncpa [#allocation10 + $0x1], 0 }
   0x6   :  { %14 = vsyncpa [#allocation8], 0 }
   0x7   :  { %16 = vsyncpa [#allocation8 + $0x1], 0  ;;  %s1685_s12 = smov 0   ;;  %s1687_s13 = smov 0  }
   0x8   :  { %s1689_s14 = smov 0   ;;  %s1691_s15 = smov 0  }
   0x9   :  { %s1693_s16 = smov 0   ;;  %s1695_s17 = smov 0  }
   0xa LB: > { %2059 = sst [smem:[#allocation16_spill]] %s1648_s16  ;;  %s1716_s18 = sadd.s32 4294967295, %s1652_s17   ;;  %s1652_s17 = sphi %s1695_s17, %s22_s17   ;;  %s1648_s16 = sphi %s1693_s16, %s2082_s16   ;;  %s1644_s15 = sphi %s1691_s15, %s2081_s15   ;;  %s1640_s14 = sphi %s1689_s14, %s2085_s14   ;;  %s1636_s13 = sphi %s1687_s13, %s2084_s13   ;;  %s1632_s12 = sphi %s1685_s12, %s2083_s12  }
   0xb   : > { %s1277_s19 = sadd.s32 4294967294, %s1652_s17   ;;  %s41_s20 = sadd.s32 1, %s1648_s16 }
   0xc   : > { %s50_s21 = sadd.s32 1, %s1640_s14  ;;  %p43_p0 = scmp.ge.s32.totalorder %s41_s20, 2 }
   0xd   : > { %p57_p1 = scmp.ne.s32.totalorder %s1640_s14, %s1636_s13  ;;  %p58_p2 = scmp.eq.s32.totalorder %s1652_s17, 0 }
   0xe   : > { %p63_p3 = scmp.ne.s32.totalorder %s1636_s13, %s1632_s12  ;;  %s2087_s20 = smov (%p43_p0, %s41_s20), 0 }
   0xf   : > { %2060 = sst [smem:[#allocation17_spill]] %s2087_s20  ;;  %p1728_p4 = por %p58_p2, %p57_p1 }
  0x10   : > { %p64_p5 = scmp.eq.s32.totalorder %s1716_s18, 0  ;;  %s45_s23 = ssub.s32 %s1648_s16, %s2087_s20 }
  0x11   : > { %p145_p6 = scmp.eq.s32.totalorder %s1716_s18, 1  ;;  %p48_p7 = scmp.eq.s32.totalorder %s45_s23, 0 }
  0x12   : > { %p1736_p8 = por %p64_p5, %p63_p3  ;;  %p151_p10 = scmp.eq.s32.totalorder %s1277_s19, 1 }
  0x13   : > { %p1740_p9 = por %p145_p6, %p57_p1  ;;  %p1393_p13 = scmp.lt.s32.totalorder %s1652_s17, 2 }
  0x14   : > { %s2062_s24 = scalar_select %p1736_p8, 1, 0 }
  0x15   : > { %s2063_s25 = scalar_select %p1740_p9, 1, 0 }
  0x16   : > { %s1745_s26 = scalar_select %p48_p7, %s1640_s14, %s50_s21  }
  0x17   : > { %p1747_p11 = por %p151_p10, %p63_p3  ;;  %s2051_s28 = sand.u32 1, %s1640_s14  }
  0x18   : > { %2064 = sst [smem:[#allocation18_spill]] %s1745_s26  ;;  %s1756_s29 = sshll.u32 %s2051_s28, 5 }
  0x19   : > { %s2065_s27 = scalar_select %p1747_p11, 1, 0 }
  0x1a   : > { %s1759_s30 = sshll.u32 %s1648_s16, 9  ;;  %p1763_p0 = pnand %p1393_p13, %p1728_p4 }
  0x1b   : > { %s193_s5 = sand.u32 1, %s1652_s17   ;;  %s2067_s1 = sld [smem:[#allocation19_spill]] }
  0x1c   : > { %s197_s9 = scalar_lea.vmem [#allocation9], %s1756_s29  ;;  %s1779_s11 = scalar_lea.sflag [#allocation10], %s193_s5 }
  0x1d   : > { %s205_s10 = sshll.u32 %s197_s9, 4  ;;  %p1785_p4 = pneg %p1763_p0  ;;  %s1776_s10 = int_to_ptr.vmem [resolvable:$true] %s205_s10 }
  0x21   : > { %s1772_s8 = scalar_lea.hbm %s2067_s1, %s1759_s30  ;;  %s1481_s6 = scalar_lea.hbm %s2067_s1, 1024 }
  0x22   : > { %s1476_s19 = scalar_lea.hbm %s1772_s8, 512  ;;  %p1482_p7 = scmp.lt.u32.totalorder %s1772_s8, %s2067_s1 }
  0x23   : > { %p1477_p3 = scmp.ne.s32.totalorder %s1772_s8, %s1476_s19  ;;  %p1483_p10 = scmp.lt.u32.totalorder %s1481_s6, %s1476_s19 }
  0x24   : > { %p1485_p12 = scmp.lt.u32.totalorder %s1476_s19, %s1772_s8 }
  0x25   : > { %p1479_p5 = pnand %p1785_p4, %p1477_p3  ;;  %p1484_p13 = por %p1483_p10, %p1482_p7 }
  0x27   : > { %p1480_p6 = pneg %p1479_p5  ;;  %p1486_p1 = por %p1485_p12, %p1484_p13 }
  0x29   : > { %p1487_p2 = pnand %p1486_p1, %p1480_p6 }
  0x2b   : > { %1490 = shalt.err (!%p1487_p2)
}
  0x2c   : > { %s1491_s5 = scalar_lea.vmem %s1776_s10, 512  ;;  %s1654_s22 = smov [#allocation9]  }
  0x2d   : > { %p1492_p3 = scmp.ne.s32.totalorder %s1776_s10, %s1491_s5  ;;  %s1496_s23 = sshll.u32 %s1654_s22, 4  ;;  %s1497_s23 = int_to_ptr.vmem [resolvable:$false] %s1496_s23 }
  0x2e   : > { %s1498_s7 = scalar_lea.vmem %s1497_s23, 1024  ;;  %p1499_p9 = scmp.lt.s32.totalorder %s1776_s10, %s1497_s23 }
  0x2f   : > { %p1494_p5 = pnand %p1492_p3, %p1785_p4  ;;  %p1500_p8 = scmp.lt.s32.totalorder %s1498_s7, %s1491_s5 }
  0x31   : > { %p1495_p11 = pneg %p1494_p5  ;;  %p1501_p7 = por %p1500_p8, %p1499_p9 }
  0x33   : > { %p1502_p10 = pnand %p1501_p7, %p1495_p11 }
  0x35   : > { %1505 = shalt.err (!%p1502_p10)
}
  0x36   : > { %s2052_s19 = smov 128   ;;  %s2054_s6 = smov 8  }
  0x37   : > { %1385 = dma.hbm_to_vmem [thread:$0]  (!%p1763_p0), %s1772_s8, 512, %s1776_s10, %s1779_s11, %s2052_s19, %s2052_s19, %s2054_s6  }
  0x38   : > { %p2069_p8 = scmp.lt.s32.totalorder %s1652_s17, 3  ;;  %p2070_p9 = scmp.ge.s32.totalorder %s1652_s17, 1 }
  0x39   : > { %s1824_s23 = scalar_lea.hbm %s2045_s0, %s1759_s30  ;;  %s175_s7 = scalar_lea.vmem [#allocation6], %s1756_s29 }
  0x3a   : > { %p1816_p11 = pnand %p2070_p9, %p2069_p8  ;;  %s183_s28 = sshll.u32 %s175_s7, 4  ;;  %s1827_s28 = int_to_ptr.vmem [resolvable:$true] %s183_s28 }
  0x3b   : > { %s1833_s19 = scalar_lea.hbm %s2047_s2, %s1759_s30  ;;  %s2072_s6 = sand.u32 1, %s1640_s14  }
  0x3c   : > { %s2071_s9 = scalar_select %p1816_p11, 1, 0 }
  0x3d   : > { %s1837_s1 = scalar_lea.sflag [#allocation7], %s2072_s6  ;;  %s1506_s20 = scalar_lea.hbm %s1824_s23, 512 }
  0x3e   : > { %p1507_p12 = scmp.ne.s32.totalorder %s1824_s23, %s1506_s20  ;;  %s1511_s16 = scalar_lea.hbm %s2045_s0, 1024 }
  0x3f   : > { %p1512_p6 = scmp.lt.u32.totalorder %s1824_s23, %s2045_s0  ;;  %p1513_p13 = scmp.lt.u32.totalorder %s1511_s16, %s1506_s20 }
  0x40   : > { %p1509_p1 = pnand %p1507_p12, %p1785_p4  ;;  %p1515_p5 = scmp.lt.u32.totalorder %s1506_s20, %s1824_s23 }
  0x41   : > { %p1514_p3 = por %p1513_p13, %p1512_p6 }
  0x42   : > { %p1510_p2 = pneg %p1509_p1 }
  0x43   : > { %p1516_p7 = por %p1515_p5, %p1514_p3 }
  0x45   : > { %p1517_p10 = pnand %p1516_p7, %p1510_p2 }
  0x47   : > { %1520 = shalt.err (!%p1517_p10)
}
  0x48   : > { %s1521_s30 = scalar_lea.vmem %s1827_s28, 512  ;;  %s1657_s6 = smov [#allocation6]  }
  0x49   : > { %p1522_p8 = scmp.ne.s32.totalorder %s1827_s28, %s1521_s30  ;;  %s1526_s8 = sshll.u32 %s1657_s6, 4  ;;  %s1527_s8 = int_to_ptr.vmem [resolvable:$false] %s1526_s8 }
  0x4a   : > { %s1528_s26 = scalar_lea.vmem %s1527_s8, 1024  ;;  %p1529_p1 = scmp.lt.s32.totalorder %s1827_s28, %s1527_s8 }
  0x4b   : > { %p1524_p9 = pnand %p1522_p8, %p1785_p4  ;;  %p1530_p11 = scmp.lt.s32.totalorder %s1528_s26, %s1521_s30 }
  0x4d   : > { %p1525_p12 = pneg %p1524_p9  ;;  %p1531_p6 = por %p1530_p11, %p1529_p1 }
  0x4f   : > { %p1532_p13 = pnand %p1531_p6, %p1525_p12 }
  0x51   : > { %1535 = shalt.err (!%p1532_p13)
}
  0x52   : > { %s2073_s16 = smov 8   ;;  %s2074_s20 = smov 128  }
  0x53   : > { %1382 = dma.hbm_to_vmem [thread:$0]  (!%p1763_p0), %s1824_s23, 512, %s1827_s28, %s1837_s1, %s2074_s20, %s2074_s20, %s2073_s16  }
  0x54   : > { %s219_s10 = scalar_lea.vmem [#allocation11], %s1756_s29  ;;  %s1536_s22 = scalar_lea.hbm %s1833_s19, 512 }
  0x55   : > { %s227_s5 = sshll.u32 %s219_s10, 4  ;;  %p1537_p11 = scmp.ne.s32.totalorder %s1833_s19, %s1536_s22  ;;  %s1865_s5 = int_to_ptr.vmem [resolvable:$true] %s227_s5 }
  0x56   : > { %s1541_s6 = scalar_lea.hbm %s2047_s2, 1024  ;;  %p1542_p5 = scmp.lt.u32.totalorder %s1833_s19, %s2047_s2 }
  0x57   : > { %p1539_p2 = pnand %p1537_p11, %p1785_p4  ;;  %p1543_p7 = scmp.lt.u32.totalorder %s1541_s6, %s1536_s22 }
  0x58   : > { %p1545_p8 = scmp.lt.u32.totalorder %s1536_s22, %s1833_s19 }
  0x59   : > { %p1540_p3 = pneg %p1539_p2  ;;  %p1544_p10 = por %p1543_p7, %p1542_p5 }
  0x5b   : > { %p1546_p9 = por %p1545_p8, %p1544_p10 }
  0x5d   : > { %p1547_p12 = pnand %p1546_p9, %p1540_p3 }
  0x5f   : > { %1550 = shalt.err (!%p1547_p12)
}
  0x60   : > { %s1551_s1 = scalar_lea.vmem %s1865_s5, 512  ;;  %s1658_s28 = smov [#allocation11]  }
  0x61   : > { %p1552_p1 = scmp.ne.s32.totalorder %s1865_s5, %s1551_s1  ;;  %s1556_s29 = sshll.u32 %s1658_s28, 4  ;;  %s1557_s29 = int_to_ptr.vmem [resolvable:$false] %s1556_s29 }
  0x62   : > { %s1558_s23 = scalar_lea.vmem %s1557_s29, 1024  ;;  %p1559_p11 = scmp.lt.s32.totalorder %s1865_s5, %s1557_s29 }
  0x63   : > { %p1554_p6 = pnand %p1552_p1, %p1785_p4  ;;  %p1560_p2 = scmp.lt.s32.totalorder %s1558_s23, %s1551_s1 }
  0x65   : > { %p1555_p13 = pneg %p1554_p6  ;;  %p1561_p5 = por %p1560_p2, %p1559_p11 }
  0x67   : > { %p1562_p7 = pnand %p1561_p5, %p1555_p13 }
  0x69   : > { %1565 = shalt.err (!%p1562_p7)
}
  0x6a   : > { %1388 = dma.hbm_to_vmem [thread:$0]  (!%p1763_p0), %s1833_s19, 512, %s1865_s5, %s1779_s11, %s2074_s20, %s2074_s20, %s2073_s16  }
  0x6b   : > { %p2075_p4 = scmp.ne.s32.totalorder %s2071_s9, 0 }
  0x6c   : > { %s1895_s21 = sand.u32 (!%p2075_p4), 1, %s1636_s13   ;;  %p2076_p3 = scmp.ne.s32.totalorder (!%p2075_p4), %s2062_s24, 0 }
  0x6d   : > { %239 = sbr.rel (%p2075_p4) target bundleno = 951 (0x3b7), region = 32  ;;  %s1898_s10 = sshll.u32 (!%p2075_p4), %s1895_s21, 5 }
  0x6e   : > { %s242_s4 = scalar_lea.sflag (!%p2075_p4), [#allocation7], %s1895_s21  ;;  %s1902_s22 = scalar_lea.vmem (!%p2075_p4), [#allocation6], %s1898_s10 }
  0x74   : > { %1619 = dma.done.wait (%p2076_p3), %s242_s4, 512  }
  0x75   : > { %1621 = vsyncadd (%p2076_p3), %s242_s4, 4294966784  ;;  %s250_s11 = sand.u32 1, %s1716_s18   ;;  %s1910_s9 = scalar_lea.vmem [#allocation9], %s1898_s10 }
  0x76   : > { %s251_s19 = scalar_lea.sflag [#allocation10], %s250_s11 }
  0x77   : > { %1623 = dma.done.wait (%p2076_p3), %s251_s19, 1024  }
  0x78   : > { %1625 = vsyncadd (%p2076_p3), %s251_s19, 4294966272  ;;  %vm312_vm0 = vcmask 261120   ;;  %v1659_v0 = vmov 0.0   ;;  %vm1660_vm1 = vmmov 0   ;;  %v333_v1 = vld [vmem:[%s1910_s9] sm:$0xff]  ;;  %v334_v3 = vld [vmem:[%s1910_s9 + $0x8] sm:$0xff] }
  0x79   : > { %1331 = vmatprep.subr.mxu0 %v1659_v0  ;;  %325 = vst.msk [vmem:[#allocation5] sm:$0xff] %vm312_vm0, %v1659_v0  ;;  %326 = vst.msk [vmem:[#allocation5 + $0x8] sm:$0xff] %vm312_vm0, %v1659_v0  ;;  %1333 = vmatprep.mubr.msk.f32.mxu0 %vm1660_vm1, %v1659_v0  ;;  %v304_v2 = vld [vmem:[%s1902_s22] sm:$0xff]  ;;  %v305_v5 = vld [vmem:[%s1902_s22 + $0x8] sm:$0xff]  ;;  %vm650_vm2 = vcmask 64512   ;;  %v1661_v29 = vmov 0  }
  0x7a   : > { %327 = vst.msk [vmem:[#allocation5 + $0x10] sm:$0xff] %vm312_vm0, %v1659_v0  ;;  %328 = vst.msk [vmem:[#allocation5 + $0x18] sm:$0xff] %vm312_vm0, %v1659_v0  ;;  %1336 = vmatprep.subr.mxu1 %v1659_v0  ;;  %1338 = vmatprep.mubr.msk.f32.mxu1 %vm1660_vm1, %v1659_v0  ;;  %v308_v4 = vmul.f32 0.17677669, %v304_v2  ;;  %v306_v6 = vld [vmem:[%s1902_s22 + $0x10] sm:$0xff]  ;;  %v307_v9 = vld [vmem:[%s1902_s22 + $0x18] sm:$0xff] }
  0x7b   : > { %1332 = vmatpush3.xpose.msk.msra.mxu0 %vm312_vm0, %v333_v1  ;;  %1337 = vmatpush3.xpose.msk.msra.mxu1 %vm312_vm0, %v334_v3  ;;  %v309_v7 = vmul.f32 0.17677669, %v305_v5  ;;  %v310_v8 = vmul.f32 0.17677669, %v306_v6  ;;  %v311_v10 = vmul.f32 0.17677669, %v307_v9 }
  0x7c   : > { %1341 = vmatprep.subr.mxu0 %v1659_v0  ;;  %1346 = vmatprep.subr.mxu1 %v1659_v0  ;;  %313 = vst.msk [vmem:[#allocation2] sm:$0xff] %vm312_vm0, %v308_v4  ;;  %v335_v11 = vld [vmem:[%s1910_s9 + $0x10] sm:$0xff]  ;;  %v336_v13 = vld [vmem:[%s1910_s9 + $0x18] sm:$0xff]  ;;  %s263_s18 = scalar_lea.vmem [#allocation11], %s1898_s10  ;;  %s295_s24 = scalar_lea.vmem [#allocation12], %s1898_s10 }
  0x7d   : > { %314 = vst.msk [vmem:[#allocation2 + $0x8] sm:$0xff] %vm312_vm0, %v309_v7  ;;  %315 = vst.msk [vmem:[#allocation2 + $0x10] sm:$0xff] %vm312_vm0, %v310_v8  ;;  %1450 = vset.pattern.permute.xlu0 %v1661_v29  ;;  %1451 = vset.pattern.permute.xlu1 %v1661_v29  ;;  %v337_v38 = vld [vmem:[%s263_s18] sm:$0xff]  ;;  %v338_v39 = vld [vmem:[%s263_s18 + $0x8] sm:$0xff]  ;;  %s1141_s16 = sshll.u32 %s295_s24, 4  ;;  %s1314_s20 = sshll.u32 %s1644_s15, 9  ;;  %s1989_s16 = int_to_ptr.vmem [resolvable:$true] %s1141_s16 }
  0x7e   : > { %316 = vst.msk [vmem:[#allocation2 + $0x18] sm:$0xff] %vm312_vm0, %v311_v10  ;;  %v339_v51 = vld [vmem:[%s263_s18 + $0x10] sm:$0xff]  ;;  %v340_v55 = vld [vmem:[%s263_s18 + $0x18] sm:$0xff]  ;;  %s1995_s30 = scalar_lea.hbm %s2048_s3, %s1314_s20  ;;  %s1127_s6 = scalar_lea.sflag [#allocation8], %s1895_s21 }
  0x7f   : > { %s1566_s8 = scalar_lea.vmem %s1989_s16, 512  ;;  %p2077_p10 = scmp.ne.s32.totalorder %s2063_s25, 0 }
  0x80   : > { %p1567_p0 = scmp.ne.s32.totalorder %s1989_s16, %s1566_s8  ;;  %s1662_s15 = smov [#allocation12]  }
  0x81   : > { %s1570_s26 = sshll.u32 %s1662_s15, 4  ;;  %s1571_s26 = int_to_ptr.vmem [resolvable:$false] %s1570_s26 }
  0x82   : > { %p1568_p8 = pnand %p1567_p0, %p2077_p10  ;;  %s1572_s1 = scalar_lea.vmem %s1571_s26, 1024 }
  0x83   : > { %v329_v12 = vld [vmem:[#allocation2] sm:$0xff]  ;;  %p1573_p12 = scmp.lt.s32.totalorder %s1989_s16, %s1571_s26  ;;  %p1574_p1 = scmp.lt.s32.totalorder %s1572_s1, %s1566_s8 }
  0x84   : > { %1334 = vmatmul.mubr.msk.f32.vlgmr.msra.gmra.mrb[0].mxu0 %vm312_vm0, %v329_v12  ;;  %v330_v14 = vld [vmem:[#allocation2 + $0x8] sm:$0xff]  ;;  %v331_v15 = vld [vmem:[#allocation2 + $0x10] sm:$0xff]  ;;  %p1569_p9 = pneg %p1568_p8 }
  0x85   : > { %1339 = vmatmul.mubr.msk.f32.vlgmr.msra.gmra.mrb[0].mxu1 %vm312_vm0, %v330_v14  ;;  %1342 = vmatpush3.xpose.msk.msra.mxu0 %vm312_vm0, %v335_v11  ;;  %v332_v16 = vld [vmem:[#allocation2 + $0x18] sm:$0xff]  ;;  %p1575_p6 = por %p1574_p1, %p1573_p12 }
  0x86   : > { %1343 = vmatprep.mubr.msk.f32.mxu0 %vm1660_vm1, %v1659_v0  ;;  %1347 = vmatpush3.xpose.msk.msra.mxu1 %vm312_vm0, %v336_v13 }
  0x87   : > { %1348 = vmatprep.mubr.msk.f32.mxu1 %vm1660_vm1, %v1659_v0  ;;  %1351 = vmatprep.subr.mxu0 %v1659_v0  ;;  %p1576_p13 = pnand %p1575_p6, %p1569_p9 }
  0x88   : > { %1344 = vmatmul.mubr.msk.f32.vlgmr.msra.gmra.mrb[2].mxu0 %vm312_vm0, %v331_v15  ;;  %1356 = vmatprep.subr.mxu1 %v1659_v0 }
  0x89   : > { %1349 = vmatmul.mubr.msk.f32.vlgmr.msra.gmra.mrb[2].mxu1 %vm312_vm0, %v332_v16  ;;  %1353 = vmatprep.mubr.msk.f32.mxu0 %vm1660_vm1, %v1659_v0 }
  0x8a   : > { %1358 = vmatprep.mubr.msk.f32.mxu1 %vm1660_vm1, %v1659_v0  ;;  %1352 = vmatpush3.msra.mxu0 %v337_v38  ;;  %v759_v38 = vld [vmem:[#allocation5] sm:$0xff] }
  0x8b   : > { %1361 = vmatprep.subr.mxu0 %v1659_v0  ;;  %1357 = vmatpush3.msra.mxu1 %v338_v39 }
  0x8c   : > { %1366 = vmatprep.subr.mxu1 %v1659_v0 }
 0x157   : > { %v414_v17 = vpop.f32.mrb[0].mxu0 }
 0x158   : > { %v1335_v18 = vpop.f32.mrb[1].mxu0  ;;  %v651_v19 = vsel %vm650_vm2, %v414_v17, -inf  ;;  %v490_v20 = vpop.f32.mrb[0].mxu1 }
 0x159   : > { %652 = vmax.xlane.f32.xlu0 %v651_v19  ;;  %v1340_v21 = vpop.f32.mrb[1].mxu1  ;;  %v654_v22 = vsel %vm650_vm2, %v490_v20, -inf }
 0x15b   : > { %v566_v23 = vpop.f32.mrb[2].mxu0 }
 0x15c   : > { %v1345_v24 = vpop.f32.mrb[3].mxu0  ;;  %v657_v25 = vsel %vm650_vm2, %v566_v23, -inf  ;;  %v642_v26 = vpop.f32.mrb[2].mxu1 }
 0x15d   : > { %655 = vmax.xlane.f32.xlu0 %v654_v22  ;;  %658 = vmax.xlane.f32.xlu1 %v657_v25  ;;  %v1350_v27 = vpop.f32.mrb[3].mxu1  ;;  %v660_v28 = vsel %vm650_vm2, %v642_v26, -inf }
 0x161   : > { %661 = vmax.xlane.f32.xlu1 %v660_v28 }
 0x1e6   : > { %v653_v30 = vpop.xlane.xlu0 %652 }
 0x1e7   : > { %v663_v31 = vmax.f32 %v653_v30, -1e+30 }
 0x1e9   : > { %681 = vperm.xlu0 %1450, %v663_v31   ;;  %v667_v62 = vsub.f32 -1e+30, %v663_v31 }
 0x1ea   : > { %v656_v32 = vpop.xlane.xlu0 %655  ;;  %v659_v33 = vpop.xlane.xlu1 %658 }
 0x1eb   : > { %v664_v34 = vmax.f32 %v656_v32, -1e+30  ;;  %v665_v35 = vmax.f32 %v659_v33, -1e+30  ;;  %v671_v2 = vmul.f32 1.442695, %v667_v62 }
 0x1ed   : > { %686 = vperm.xlu1 %1451, %v664_v34   ;;  %v668_v59 = vsub.f32 -1e+30, %v664_v34  ;;  %v669_v3 = vsub.f32 -1e+30, %v665_v35 }
 0x1ee   : > { %v662_v36 = vpop.xlane.xlu1 %661 }
 0x1ef   : > { %v666_v37 = vmax.f32 %v662_v36, -1e+30  ;;  %v673_v63 = vmul.f32 1.442695, %v668_v59 }
 0x1f1   : > { %691 = vperm.xlu1 %1451, %v665_v35   ;;  %v670_v4 = vsub.f32 -1e+30, %v666_v37 }
 0x1f3   : > { %v677_v5 = vmul.f32 1.442695, %v670_v4 }
 0x1f5   : > { %696 = vperm.xlu1 %1451, %v666_v37  }
 0x268   : > { %v682_v40 = vpop.permute.xlu0 %681 }
 0x269   : > { %v699_v41 = vsub.f32 %v414_v17, %v682_v40 }
 0x26b   : > { %v703_v42 = vmul.f32 1.442695, %v699_v41  ;;  %v760_v41 = vld [vmem:[#allocation5 + $0x8] sm:$0xff] }
 0x26c   : > { %v687_v43 = vpop.permute.xlu1 %686 }
 0x26d   : > { %1452 = vpow2.f32 %v703_v42  ;;  %v700_v44 = vsub.f32 %v490_v20, %v687_v43 }
 0x26f   : > { %v705_v45 = vmul.f32 1.442695, %v700_v44 }
 0x270   : > { %v692_v46 = vpop.permute.xlu1 %691 }
 0x271   : > { %1454 = vpow2.f32 %v705_v45  ;;  %v701_v47 = vsub.f32 %v566_v23, %v692_v46 }
 0x273   : > { %v707_v48 = vmul.f32 1.442695, %v701_v47 }
 0x274   : > { %v697_v49 = vpop.permute.xlu1 %696 }
 0x275   : > { %1456 = vpow2.f32 %v707_v48  ;;  %v702_v50 = vsub.f32 %v642_v26, %v697_v49  ;;  %v761_v48 = vld [vmem:[#allocation5 + $0x10] sm:$0xff] }
 0x277   : > { %v1453_v52 = vpop.eup %1452  ;;  %v709_v53 = vmul.f32 1.442695, %v702_v50 }
 0x278   : > { %1354 = vmatmul.mubr.msk.f32.vlgmr.msra.gmra.mrb[4].mxu0 %vm650_vm2, %v1453_v52  ;;  %v719_v54 = vsel %vm650_vm2, %v1453_v52, 0.0 }
 0x279   : > { %1458 = vpow2.f32 %v709_v53  ;;  %720 = vadd.xlane.f32.xlu1 %v719_v54  ;;  %1362 = vmatpush3.msra.mxu0 %v339_v51  ;;  %v762_v53 = vld [vmem:[#allocation5 + $0x18] sm:$0xff] }
 0x27a   : > { %1363 = vmatprep.mubr.msk.f32.mxu0 %vm1660_vm1, %v1659_v0  ;;  %1460 = vpow2.f32 %v673_v63 }
 0x27b   : > { %v1455_v56 = vpop.eup %1454  ;;  %1462 = vpow2.f32 %v671_v2 }
 0x27c   : > { %1359 = vmatmul.mubr.msk.f32.vlgmr.msra.gmra.mrb[4].mxu1 %vm650_vm2, %v1455_v56  ;;  %v722_v57 = vsel %vm650_vm2, %v1455_v56, 0.0 }
 0x27d   : > { %723 = vadd.xlane.f32.xlu0 %v722_v57  ;;  %1367 = vmatpush3.msra.mxu1 %v340_v55 }
 0x27e   : > { %1368 = vmatprep.mubr.msk.f32.mxu1 %vm1660_vm1, %v1659_v0  ;;  %v675_v0 = vmul.f32 1.442695, %v669_v3 }
 0x27f   : > { %v1457_v58 = vpop.eup %1456 }
 0x280   : > { %1364 = vmatmul.mubr.msk.f32.vlgmr.msra.gmra.mrb[6].mxu0 %vm650_vm2, %v1457_v58  ;;  %v725_v60 = vsel %vm650_vm2, %v1457_v58, 0.0  ;;  %1464 = vpow2.f32 %v675_v0 }
 0x281   : > { %726 = vadd.xlane.f32.xlu1 %v725_v60  ;;  %1466 = vpow2.f32 %v677_v5 }
 0x283   : > { %v1459_v61 = vpop.eup %1458 }
 0x284   : > { %1369 = vmatmul.mubr.msk.f32.vlgmr.msra.gmra.mrb[6].mxu1 %vm650_vm2, %v1459_v61  ;;  %v728_v1 = vsel %vm650_vm2, %v1459_v61, 0.0  ;;  %v1461_v6 = vpop.eup %1460 }
 0x285   : > { %729 = vadd.xlane.f32.xlu1 %v728_v1  ;;  %v1463_v7 = vpop.eup %1462  ;;  %v716_v13 = vmul.f32 0.0, %v1461_v6 }
 0x286   : > { %v715_v10 = vmul.f32 0.0, %v1463_v7 }
 0x28a   : > { %v1465_v8 = vpop.eup %1464 }
 0x28b   : > { %v1467_v9 = vpop.eup %1466  ;;  %v717_v16 = vmul.f32 0.0, %v1465_v8 }
 0x28c   : > { %v718_v19 = vmul.f32 0.0, %v1467_v9 }
 0x293   : > { %746 = vperm.xlu0 %1450, %v1461_v6  }
 0x296   : > { %741 = vperm.xlu1 %1451, %v1463_v7  }
 0x29a   : > { %751 = vperm.xlu1 %1451, %v1465_v8  }
 0x29e   : > { %756 = vperm.xlu1 %1451, %v1467_v9  }
 0x306   : > { %v721_v11 = vpop.xlane.xlu1 %720 }
 0x307   : > { %v731_v12 = vadd.f32 %v721_v11, %v715_v10 }
 0x309   : > { %1468 = vrcp.f32 %v731_v12 }
 0x30a   : > { %v724_v14 = vpop.xlane.xlu0 %723 }
 0x30b   : > { %v732_v15 = vadd.f32 %v724_v14, %v716_v13 }
 0x30d   : > { %1470 = vrcp.f32 %v732_v15 }
 0x30e   : > { %v727_v17 = vpop.xlane.xlu1 %726 }
 0x30f   : > { %v733_v18 = vadd.f32 %v727_v17, %v717_v16 }
 0x311   : > { %1472 = vrcp.f32 %v733_v18 }
 0x312   : > { %v730_v20 = vpop.xlane.xlu1 %729  ;;  %v747_v42 = vpop.permute.xlu0 %746 }
 0x313   : > { %v1469_v21 = vpop.eup %1468  ;;  %v734_v22 = vadd.f32 %v730_v20, %v718_v19  ;;  %v764_v47 = vmul.f32 %v760_v41, %v747_v42 }
 0x314   : > { %v1082_v23 = vmul.f32 %v1469_v21, %v731_v12 }
 0x315   : > { %1474 = vrcp.f32 %v734_v22 }
 0x316   : > { %v1086_v24 = vsub.f32 2.0, %v1082_v23  ;;  %v742_v39 = vpop.permute.xlu1 %741 }
 0x317   : > { %v1471_v25 = vpop.eup %1470  ;;  %v763_v40 = vmul.f32 %v759_v38, %v742_v39 }
 0x318   : > { %v1083_v26 = vmul.f32 %v1471_v25, %v732_v15  ;;  %v1090_v27 = vmul.f32 %v1469_v21, %v1086_v24 }
 0x31a   : > { %v1087_v28 = vsub.f32 2.0, %v1083_v26  ;;  %1100 = vperm.xlu1 %1451, %v1090_v27   ;;  %v752_v46 = vpop.permute.xlu1 %751 }
 0x31b   : > { %v1473_v29 = vpop.eup %1472  ;;  %v765_v52 = vmul.f32 %v761_v48, %v752_v46 }
 0x31c   : > { %v1084_v30 = vmul.f32 %v1473_v29, %v733_v18  ;;  %v1091_v31 = vmul.f32 %v1471_v25, %v1087_v28 }
 0x31e   : > { %v1088_v32 = vsub.f32 2.0, %v1084_v30  ;;  %1105 = vperm.xlu0 %1450, %v1091_v31   ;;  %v757_v54 = vpop.permute.xlu1 %756 }
 0x31f   : > { %v1475_v33 = vpop.eup %1474  ;;  %v766_v58 = vmul.f32 %v762_v53, %v757_v54 }
 0x320   : > { %v1085_v34 = vmul.f32 %v1475_v33, %v734_v22  ;;  %v1092_v35 = vmul.f32 %v1473_v29, %v1088_v32 }
 0x322   : > { %v1089_v36 = vsub.f32 2.0, %v1085_v34  ;;  %1110 = vperm.xlu1 %1451, %v1092_v35  }
 0x324   : > { %v1093_v37 = vmul.f32 %v1475_v33, %v1089_v36 }
 0x326   : > { %1115 = vperm.xlu0 %1450, %v1093_v37  }
 0x34b   : > { %v836_v43 = vpop.f32.mrb[4].mxu0 }
 0x34c   : > { %v1059_v44 = vadd.f32 %v836_v43, %v763_v40  ;;  %v1355_v45 = vpop.f32.mrb[5].mxu0 }
 0x34e   : > { %1063 = vst.msk [vmem:[#allocation5] sm:$0xff] %vm312_vm0, %v1059_v44 }
 0x34f   : > { %v909_v49 = vpop.f32.mrb[4].mxu1 }
 0x350   : > { %v1060_v50 = vadd.f32 %v909_v49, %v764_v47  ;;  %v1360_v51 = vpop.f32.mrb[5].mxu1 }
 0x352   : > { %1064 = vst.msk [vmem:[#allocation5 + $0x8] sm:$0xff] %vm312_vm0, %v1060_v50 }
 0x353   : > { %v982_v55 = vpop.f32.mrb[6].mxu0 }
 0x354   : > { %v1061_v56 = vadd.f32 %v982_v55, %v765_v52  ;;  %v1365_v57 = vpop.f32.mrb[7].mxu0 }
 0x355   : > { %v1094_v63 = vld [vmem:[#allocation5] sm:$0xff] }
 0x356   : > { %1065 = vst.msk [vmem:[#allocation5 + $0x10] sm:$0xff] %vm312_vm0, %v1061_v56 }
 0x357   : > { %v1055_v59 = vpop.f32.mrb[6].mxu1 }
 0x358   : > { %v1062_v60 = vadd.f32 %v1055_v59, %v766_v58  ;;  %v1370_v61 = vpop.f32.mrb[7].mxu1 }
 0x359   : > { %v1095_v2 = vld [vmem:[#allocation5 + $0x8] sm:$0xff] }
 0x35a   : > { %1066 = vst.msk [vmem:[#allocation5 + $0x18] sm:$0xff] %vm312_vm0, %v1062_v60 }
 0x35d   : > { %v1096_v5 = vld [vmem:[#allocation5 + $0x10] sm:$0xff] }
 0x361   : > { %v1097_v8 = vld [vmem:[#allocation5 + $0x18] sm:$0xff] }
 0x399   : > { %v1101_v62 = vpop.permute.xlu1 %1100 }
 0x39a   : > { %v1118_v1 = vmul.f32 %v1101_v62, %v1094_v63 }
 0x39c   : > { %1122 = vst.msk [vmem:[%s295_s24] sm:$0xff] %vm312_vm0, %v1118_v1 }
 0x39d   : > { %v1106_v3 = vpop.permute.xlu0 %1105 }
 0x39e   : > { %v1119_v0 = vmul.f32 %v1106_v3, %v1095_v2 }
 0x3a0   : > { %1123 = vst.msk [vmem:[%s295_s24 + $0x8] sm:$0xff] %vm312_vm0, %v1119_v0 }
 0x3a1   : > { %v1111_v4 = vpop.permute.xlu1 %1110 }
 0x3a2   : > { %v1120_v6 = vmul.f32 %v1111_v4, %v1096_v5 }
 0x3a4   : > { %1124 = vst.msk [vmem:[%s295_s24 + $0x10] sm:$0xff] %vm312_vm0, %v1120_v6 }
 0x3a5   : > { %v1116_v7 = vpop.permute.xlu0 %1115 }
 0x3a6   : > { %v1121_v9 = vmul.f32 %v1116_v7, %v1097_v8 }
 0x3a8   : > { %1125 = vst.msk [vmem:[%s295_s24 + $0x18] sm:$0xff] %vm312_vm0, %v1121_v9 }
 0x3a9   : > { %1579 = shalt.err (!%p1576_p13)
}
 0x3aa   : > { %s1580_s28 = scalar_lea.hbm %s1995_s30, 512  ;;  %s1584_s10 = scalar_lea.hbm %s2048_s3, 1024 }
 0x3ab   : > { %p1581_p11 = scmp.ne.s32.totalorder %s1995_s30, %s1580_s28  ;;  %p1585_p7 = scmp.lt.u32.totalorder %s1995_s30, %s2048_s3 }
 0x3ac   : > { %p1586_p4 = scmp.lt.u32.totalorder %s1584_s10, %s1580_s28  ;;  %p1588_p0 = scmp.lt.u32.totalorder %s1580_s28, %s1995_s30 }
 0x3ad   : > { %p1582_p2 = pnand %p1581_p11, %p2077_p10 }
 0x3ae   : > { %p1587_p3 = por %p1586_p4, %p1585_p7 }
 0x3af   : > { %p1583_p5 = pneg %p1582_p2 }
 0x3b0   : > { %p1589_p8 = por %p1588_p0, %p1587_p3 }
 0x3b2   : > { %p1590_p9 = pnand %p1589_p8, %p1583_p5 }
 0x3b4   : > { %1593 = shalt.err (!%p1590_p9)
}
 0x3b5   : > { %s1663_s11 = smov 128   ;;  %s1664_s19 = smov 8  }
 0x3b6   : > { %1377 = dma.vmem_to_hbm [thread:$0]  (%p2077_p10), %s1989_s16, 512, %s1995_s30, %s1127_s6, %s1663_s11, %s1663_s11, %s1664_s19  }
 0x3b7 PF: > { %s1156_s9 = sand.u32 1, %s1632_s12   ;;  %p2078_p12 = scmp.ne.s32.totalorder %s2065_s27, 0 }
 0x3b8   : > { %p2079_p1 = scmp.ge.s32.totalorder %s1652_s17, 2  ;;  %s1157_s18 = scalar_lea.sflag [#allocation8], %s1156_s9 }
 0x3ba   : > { %p1390_p6 = pnand %p2079_p1, %p2078_p12 }
 0x3bc   : > { %1627 = dma.done.wait (!%p1390_p6), %s1157_s18, 512  }
 0x3bd   : > { %1629 = vsyncadd (!%p1390_p6), %s1157_s18, 4294966784  ;;  %s22_s17 = sadd.s32 1, %s1652_s17   ;;  %s2080_s24 = sld [smem:[#allocation18_spill]] }
 0x3be   : > { %p19_p13 = scmp.ge.s32.totalorder %s22_s17, 4   ;;  %s2081_s15 = sld [smem:[#allocation16_spill]] }
 0x3bf   : > { %s2082_s16 = sld [smem:[#allocation17_spill]]  ;;  %s2083_s12 = smov %s1636_s13 }
 0x3c0   : > { %s2084_s13 = smov %s1640_s14  ;;  %21 = sbr.rel (!%p19_p13) target bundleno = 10 (0xa), region = 109 }
 0x3c3   : > { %s2085_s14 = smov %s2080_s24 }
 0x3c7   :  { %1162 = vsyncpa [#allocation7], 1 }
 0x3c8   :  { %1164 = vsyncpa [#allocation7 + $0x1], 1 }
 0x3c9   :  { %1165 = vsyncpa [#allocation10], 1 }
 0x3ca   :  { %1167 = vsyncpa [#allocation10 + $0x1], 1 }
 0x3cb   :  { %1168 = vsyncpa [#allocation8], 1 }
 0x3cc   :  { %1170 = vsyncpa [#allocation8 + $0x1], 1 }

</bundles_post_ra>
